<compile_context>
chip_gen: v6e
topology: v6e:2x2x1
jax: 0.10.0
libtpu: 0.0.40
codegen_flags: <defaults>
</compile_context>

<pallas_src>
import jax
import jax.numpy as jnp
from jax.experimental import pallas as pl
from jax.experimental.pallas import tpu as pltpu

TB_MAX = 8192  # batch-tile (lane) cap; sized for v7x's 64 MiB VMEM, fine on v5e/v6e


def _round_up(n, m):
    return ((n + m - 1) // m) * m


def _pick_tiling(B):
    """Choose (tile, padded_batch).  Keeps >=2 grid steps for large B (v7x has
    2 TensorCores) and bounds padding waste instead of always rounding to TB_MAX."""
    if B <= 1024:
        tb = _round_up(max(B, 1), 128)                      # one small tile
    else:
        n_steps = max(2, pl.cdiv(B, TB_MAX))                # >=2 so both v7x TCs work
        tb = min(TB_MAX, _round_up(pl.cdiv(B, n_steps), 512))
    b_pad = _round_up(B, tb)
    return tb, b_pad


def value_net_kernel(x_ref, w1_ref, w2_ref, b2_ref, out_ref):
    # x_ref : (4, tb)    f32   (rows = [obs0, obs1, obs2, 1.0], batch on lanes)
    # w1_ref: (128, 4)   f32   ([W1 | b1], resident across grid steps)
    # w2_ref: (1, 128)   f32   (second-layer weight row, resident)
    # b2_ref: (1, 1)     f32   (scalar in SMEM)
    # out   : (1, tb)    f32   (lane-dense output)
    h = jnp.dot(w1_ref[...], x_ref[...],
                preferred_element_type=jnp.float32)          # (128, tb)  MXU, bias folded in
    h = jnp.maximum(h, 0.0)                                  # ReLU (VPU)
    y = jnp.dot(w2_ref[...], h,
                preferred_element_type=jnp.float32)          # (1, tb)    MXU
    out_ref[...] = (y + b2_ref[0, 0]).astype(out_ref.dtype)


def value_net_forward(x, w1, b1, w2, b2):
    """x: (B, 3) f32 -> (B, 1) f32.   w1:(128,3) b1:(128,1) w2:(1,128) b2:(1,1)."""
    B = x.shape[0]
    tb, b_pad = _pick_tiling(B)
    grid = (b_pad // tb,)

    # Single relayout: (B,3) -> (3,B), then one pad that both appends the ones
    # row (bias input) and pads the batch lanes.  Padded lanes become 1.0 —
    # harmless garbage, never reduced across lanes, sliced off below.
    # TODO(synk): callers that can supply x already as (3, B) avoid this relayout.
    x_aug = jnp.pad(x.T, ((0, 1), (0, b_pad - B)), constant_values=1.0)   # (4, b_pad)
    w1_aug = jnp.concatenate([w1, b1], axis=1)                            # (128, 4)

    flops = 2 * b_pad * (4 * 128 + 128 * 1)
    bytes_accessed = 4 * (4 * b_pad + 1 * b_pad + 128 * 4 + 128 + 1)

    out_t = pl.pallas_call(
        value_net_kernel,
        out_shape=jax.ShapeDtypeStruct((1, b_pad), jnp.float32),
        grid=grid,
        in_specs=[
            pl.BlockSpec((4, tb), lambda i: (0, i)),            # x stream, pipelined
            pl.BlockSpec((128, 4), lambda i: (0, 0)),           # [W1|b1] resident
            pl.BlockSpec((1, 128), lambda i: (0, 0)),           # W2 row resident
            pl.BlockSpec(memory_space=pltpu.MemorySpace.SMEM),  # b2 scalar in SMEM
        ],
        out_specs=pl.BlockSpec((1, tb), lambda i: (0, i)),      # lane-dense output
        compiler_params=pltpu.CompilerParams(
            dimension_semantics=("parallel",),                  # shards across TCs on v7x
            vmem_limit_bytes=32 * 1024 * 1024,
        ),
        cost_estimate=pl.CostEstimate(
            flops=flops, transcendentals=0, bytes_accessed=bytes_accessed),
    )(x_aug, w1_aug, w2, b2)

    # Back to PyTorch layout: (B, 1).
    return out_t[:, :B].T


def init_params(key):
    """Init mirroring PyTorch nn.Linear defaults (uniform +/- 1/sqrt(fan_in)).
    Layouts: w1 (128,3), b1 (128,1), w2 (1,128), b2 (1,1)."""
    k1, k2, k3, k4 = jax.random.split(key, 4)
    bound1 = 1.0 / jnp.sqrt(3.0)
    bound2 = 1.0 / jnp.sqrt(128.0)
    w1 = jax.random.uniform(k1, (128, 3), jnp.float32, -bound1, bound1)
    b1 = jax.random.uniform(k2, (128, 1), jnp.float32, -bound1, bound1)
    w2 = jax.random.uniform(k3, (1, 128), jnp.float32, -bound2, bound2)
    b2 = jax.random.uniform(k4, (1, 1), jnp.float32, -bound2, bound2)
    return w1, b1, w2, b2


def reference(x, w1, b1, w2, b2):
    h = jnp.maximum(x @ w1.T + b1.T, 0.0)   # (B, 128)
    return h @ w2.T + b2                    # (B, 1)


if __name__ == "__main__":
    key = jax.random.PRNGKey(0)
    pkey, xkey, xkey2 = jax.random.split(key, 3)
    w1, b1, w2, b2 = init_params(pkey)

    # Pendulum-v1 observation: (cos(theta), sin(theta), theta_dot) -> 3 features.
    B = 8
    x = jax.random.normal(xkey, (B, 3), jnp.float32)
    out = jax.block_until_ready(value_net_forward(x, w1, b1, w2, b2))
    assert out.shape == (B, 1)
    assert jnp.allclose(out, reference(x, w1, b1, w2, b2), atol=1e-5), "mismatch (B=8)"

    # Larger, non-aligned batch to exercise the multi-step grid + padding path.
    B2 = 4096 + 37
    x2 = jax.random.normal(xkey2, (B2, 3), jnp.float32)
    out2 = jax.block_until_ready(value_net_forward(x2, w1, b1, w2, b2))
    assert out2.shape == (B2, 1)
    assert jnp.allclose(out2, reference(x2, w1, b1, w2, b2), atol=1e-4), "mismatch (B=4133)"

    print("KERNEL_OK")
</pallas_src>

<mosaic_0001>
module attributes {stable_mosaic.version = 11 : i64} {
  func.func @value_net_kernel(%arg0: i32, %arg1: memref<4x128xf32, #tpu.memory_space<vmem>>, %arg2: memref<128x4xf32, #tpu.memory_space<vmem>>, %arg3: memref<1x128xf32, #tpu.memory_space<vmem>>, %arg4: memref<1x1xf32, #tpu.memory_space<smem>>, %arg5: memref<1x128xf32, #tpu.memory_space<vmem>>) attributes {dimension_semantics = [#tpu.dimension_semantics<parallel>], iteration_bounds = array<i64: 1>, scalar_prefetch = 0 : i64, scratch_operands = 0 : i64, tpu.core_type = #tpu.core_type<tc>, window_params = [{transform_indices = @transform_0, window_bounds = array<i64: 4, 128>}, {pipeline_mode = #tpu.pipeline_mode<synchronous>, transform_indices = @transform_1, window_bounds = array<i64: 128, 4>}, {pipeline_mode = #tpu.pipeline_mode<synchronous>, transform_indices = @transform_2, window_bounds = array<i64: 1, 128>}, {transform_indices = @transform_3, window_bounds = array<i64: 1, 1>}, {transform_indices = @transform_4, window_bounds = array<i64: 1, 128>}]} {
    %c0 = arith.constant 0 : index
    %c0_0 = arith.constant 0 : index
    %0 = vector.load %arg2[%c0, %c0_0] : memref<128x4xf32, #tpu.memory_space<vmem>>, vector<128x4xf32>
    %c0_1 = arith.constant 0 : index
    %c0_2 = arith.constant 0 : index
    %1 = vector.load %arg1[%c0_1, %c0_2] : memref<4x128xf32, #tpu.memory_space<vmem>>, vector<4x128xf32>
    %cst = arith.constant dense<0.000000e+00> : vector<128x128xf32>
    %2 = tpu.matmul %0, %1, %cst {dimension_numbers = #tpu.dot_dimension_numbers<[1], [0], [0], [1], [0, 0, 1, 1], [], []>} : vector<128x4xf32>, vector<4x128xf32>, vector<128x128xf32> -> vector<128x128xf32>
    %cst_3 = arith.constant 0.000000e+00 : f32
    %3 = vector.broadcast %cst_3 : f32 to vector<128x128xf32>
    %4 = arith.maximumf %2, %3 : vector<128x128xf32>
    %c0_4 = arith.constant 0 : index
    %c0_5 = arith.constant 0 : index
    %5 = vector.load %arg3[%c0_4, %c0_5] : memref<1x128xf32, #tpu.memory_space<vmem>>, vector<1x128xf32>
    %cst_6 = arith.constant dense<0.000000e+00> : vector<1x128xf32>
    %6 = tpu.matmul %5, %4, %cst_6 {dimension_numbers = #tpu.dot_dimension_numbers<[1], [0], [0], [1], [0, 0, 1, 1], [], []>} : vector<1x128xf32>, vector<128x128xf32>, vector<1x128xf32> -> vector<1x128xf32>
    %c0_7 = arith.constant 0 : index
    %c0_8 = arith.constant 0 : index
    %7 = memref.load %arg4[%c0_7, %c0_8] : memref<1x1xf32, #tpu.memory_space<smem>>
    %8 = vector.broadcast %7 : f32 to vector<1x128xf32>
    %9 = arith.addf %6, %8 : vector<1x128xf32>
    %c0_9 = arith.constant 0 : index
    %c0_10 = arith.constant 0 : index
    %10 = vector.load %arg5[%c0_9, %c0_10] : memref<1x128xf32, #tpu.memory_space<vmem>>, vector<1x128xf32>
    tpu.vector_store %arg5[%c0_9, %c0_10], %9 {strides = array<i32>} : memref<1x128xf32, #tpu.memory_space<vmem>>, vector<1x128xf32>,
    return
  }
  func.func @transform_0(%arg0: i32) -> (i32, i32) {
    %c0_i32 = arith.constant 0 : i32
    %c0_i32_0 = arith.constant 0 : i32
    return %c0_i32, %arg0 : i32, i32
  }
  func.func @transform_1(%arg0: i32) -> (i32, i32) {
    %c0_i32 = arith.constant 0 : i32
    %c0_i32_0 = arith.constant 0 : i32
    %c0_i32_1 = arith.constant 0 : i32
    return %c0_i32, %c0_i32_0 : i32, i32
  }
  func.func @transform_2(%arg0: i32) -> (i32, i32) {
    %c0_i32 = arith.constant 0 : i32
    %c0_i32_0 = arith.constant 0 : i32
    %c0_i32_1 = arith.constant 0 : i32
    return %c0_i32, %c0_i32_0 : i32, i32
  }
  func.func @transform_3(%arg0: i32) -> (i32, i32) {
    %c0_i32 = arith.constant 0 : i32
    %c0_i32_0 = arith.constant 0 : i32
    %c0_i32_1 = arith.constant 0 : i32
    return %c0_i32, %c0_i32_0 : i32, i32
  }
  func.func @transform_4(%arg0: i32) -> (i32, i32) {
    %c0_i32 = arith.constant 0 : i32
    %c0_i32_0 = arith.constant 0 : i32
    return %c0_i32, %arg0 : i32, i32
  }
}

</mosaic_0001>

<bundles_post_ra>
// kernel: tpu_custom_call.1
= control target key start
LH: loop header
LB: loop body
LE: loop exit
PB: predicated region body
PF: predicated region fallthrough
CT: control target
= control target key end

     0   :  { %vm85_vm0 = vcmask 1043456   ;;  %vm36_vm1 = vcmask 31744   ;;  %s596_s0 = inlined_call_operand.vmem [shape: f32[4,128], index: 0, kind: input, shape index: {}]   ;;  %s597_s1 = inlined_call_operand.vmem [shape: f32[128,4], index: 1, kind: input, shape index: {}]   ;;  %s598_s2 = inlined_call_operand.vmem [shape: f32[1,128], index: 2, kind: input, shape index: {}]   ;;  %s599_s3 = inlined_call_operand.<no memory space> [shape: f32[1,1], index: 3, kind: input, shape index: {}]   ;;  %s600_s4 = inlined_call_operand.hbm [shape: f32[1,128], index: 4, kind: output, shape index: {}]  }
   0x1   :  { %v35_v0 = vld [vmem:[%s596_s0] sm:$0xf]  ;;  %v20_v2 = vld [vmem:[%s597_s1 + $0x8] sm:$0xff]  ;;  %v21_v3 = vld [vmem:[%s597_s1 + $0x10] sm:$0xff] }
   0x2   :  { %v19_v1 = vld [vmem:[%s597_s1] sm:$0xff]  ;;  %389 = vmatprep.subr.msk.mxu0 %vm85_vm0, %v35_v0  ;;  %v22_v4 = vld [vmem:[%s597_s1 + $0x18] sm:$0xff] }
   0x3   :  { %391 = vmatprep.mubr.msk.f32.mxu0 %vm36_vm1, %v19_v1  ;;  %390 = vmatpush3.msk.msra.mxu0 %vm85_vm0, %v35_v0  ;;  %v23_v5 = vld [vmem:[%s597_s1 + $0x20] sm:$0xff] }
   0x4   :  { %392 = vmatmul.mubr.msk.f32.vlgmr.msra.gmra.mxu0 %vm36_vm1, %v20_v2 }
   0x5   :  { %394 = vmatprep.mubr.msk.f32.mxu0 %vm36_vm1, %v21_v3 }
   0x6   :  { %10 = vsyncpa [#allocation4], 0  ;;  %v24_v6 = vld [vmem:[%s597_s1 + $0x28] sm:$0xff]  ;;  %v25_v7 = vld [vmem:[%s597_s1 + $0x30] sm:$0xff]  ;;  %v475_v17 = vmov 0.0   ;;  %vm476_vm2 = vmmov 0   ;;  %v252_v51 = vstv %s599_s3 }
   0x7   :  { %v26_v8 = vld [vmem:[%s597_s1 + $0x38] sm:$0xff]  ;;  %v27_v9 = vld [vmem:[%s597_s1 + $0x40] sm:$0xff]  ;;  %v28_v10 = vld [vmem:[%s597_s1 + $0x48] sm:$0xff]  ;;  %415 = vmatprep.subr.mxu1 %v475_v17  ;;  %447 = vmatprep.mubr.msk.f32.mxu1 %vm476_vm2, %v475_v17  ;;  %s477_s24 = smov [#allocation3]  }
   0x8   :  { %395 = vmatmul.mubr.msk.f32.gmra.mxu0 %vm36_vm1, %v22_v4  ;;  %v29_v11 = vld [vmem:[%s597_s1 + $0x50] sm:$0xff]  ;;  %v30_v12 = vld [vmem:[%s597_s1 + $0x58] sm:$0xff]  ;;  %v31_v13 = vld [vmem:[%s597_s1 + $0x60] sm:$0xff]  ;;  %s330_s25 = sshll.u32 %s477_s24, 4  ;;  %s331_s25 = int_to_ptr.vmem [resolvable:$true] %s330_s25 }
   0x9   :  { %397 = vmatprep.mubr.msk.f32.mxu0 %vm36_vm1, %v23_v5  ;;  %v32_v14 = vld [vmem:[%s597_s1 + $0x68] sm:$0xff]  ;;  %v33_v15 = vld [vmem:[%s597_s1 + $0x70] sm:$0xff]  ;;  %v34_v16 = vld [vmem:[%s597_s1 + $0x78] sm:$0xff]  ;;  %s453_s26 = scalar_lea.vmem %s331_s25, 16  ;;  %s457_s27 = scalar_lea.vmem %s331_s25, 32 }
   0xa   :  { %v250_v50 = vld [vmem:[%s598_s2] sm:$0x1]  ;;  %p454_p0 = scmp.ne.s32.totalorder %s331_s25, %s453_s26  ;;  %p458_p1 = scmp.lt.s32.totalorder %s331_s25, %s331_s25 }
   0xb   :  { %p459_p2 = scmp.lt.s32.totalorder %s457_s27, %s453_s26 }
   0xc   :  { %398 = vmatmul.mubr.msk.f32.gmra.mxu0 %vm36_vm1, %v24_v6 }
   0xd   :  { %400 = vmatprep.mubr.msk.f32.mxu0 %vm36_vm1, %v25_v7  ;;  %p460_p3 = por %p459_p2, %p458_p1 }
   0xf   :  { %p461_p4 = pnand %p460_p3, %p454_p0 }
  0x10   :  { %401 = vmatmul.mubr.msk.f32.gmra.mxu0 %vm36_vm1, %v26_v8 }
  0x11   :  { %403 = vmatprep.mubr.msk.f32.mxu0 %vm36_vm1, %v27_v9 }
  0x14   :  { %404 = vmatmul.mubr.msk.f32.gmra.mxu0 %vm36_vm1, %v28_v10 }
  0x15   :  { %406 = vmatprep.mubr.msk.f32.mxu0 %vm36_vm1, %v29_v11 }
  0x18   :  { %407 = vmatmul.mubr.msk.f32.gmra.mxu0 %vm36_vm1, %v30_v12 }
  0x19   :  { %409 = vmatprep.mubr.msk.f32.mxu0 %vm36_vm1, %v31_v13 }
  0x1c   :  { %410 = vmatmul.mubr.msk.f32.gmra.mxu0 %vm36_vm1, %v32_v14 }
  0x1d   :  { %412 = vmatprep.mubr.msk.f32.mxu0 %vm36_vm1, %v33_v15 }
  0x20   :  { %413 = vmatmul.mubr.msk.f32.gmra.mxu0 %vm36_vm1, %v34_v16 }
  0xc4   :  { %v393_v18 = vpop.f32.mrf.mxu0 }
  0xc5   :  { %v235_v48 = vmax.f32 %v393_v18, 0.0 }
  0xc6   :  { %v155_v19 = vpop.f32.mrf.mxu0 }
  0xc7   :  { %v234_v49 = vmax.f32 %v155_v19, 0.0 }
  0xc8   :  { %v396_v20 = vpop.f32.mrf.mxu0 }
  0xc9   :  { %v237_v46 = vmax.f32 %v396_v20, 0.0 }
  0xca   :  { %v165_v21 = vpop.f32.mrf.mxu0 }
  0xcb   :  { %v236_v47 = vmax.f32 %v165_v21, 0.0 }
  0xcc   :  { %v399_v22 = vpop.f32.mrf.mxu0 }
  0xcd   :  { %v239_v44 = vmax.f32 %v399_v22, 0.0 }
  0xce   :  { %v175_v23 = vpop.f32.mrf.mxu0 }
  0xcf   :  { %v238_v45 = vmax.f32 %v175_v23, 0.0 }
  0xd0   :  { %v402_v24 = vpop.f32.mrf.mxu0 }
  0xd1   :  { %v241_v42 = vmax.f32 %v402_v24, 0.0 }
  0xd2   :  { %v185_v25 = vpop.f32.mrf.mxu0 }
  0xd3   :  { %v240_v43 = vmax.f32 %v185_v25, 0.0 }
  0xd4   :  { %v405_v26 = vpop.f32.mrf.mxu0 }
  0xd5   :  { %v243_v40 = vmax.f32 %v405_v26, 0.0 }
  0xd6   :  { %v195_v27 = vpop.f32.mrf.mxu0 }
  0xd7   :  { %v242_v41 = vmax.f32 %v195_v27, 0.0 }
  0xd8   :  { %v408_v28 = vpop.f32.mrf.mxu0 }
  0xd9   :  { %v245_v38 = vmax.f32 %v408_v28, 0.0 }
  0xda   :  { %v205_v29 = vpop.f32.mrf.mxu0 }
  0xdb   :  { %v244_v39 = vmax.f32 %v205_v29, 0.0 }
  0xdc   :  { %v411_v30 = vpop.f32.mrf.mxu0 }
  0xdd   :  { %v247_v36 = vmax.f32 %v411_v30, 0.0 }
  0xde   :  { %v215_v31 = vpop.f32.mrf.mxu0 }
  0xdf   :  { %v246_v37 = vmax.f32 %v215_v31, 0.0 }
  0xe0   :  { %v414_v32 = vpop.f32.mrf.mxu0 }
  0xe1   :  { %v249_v33 = vmax.f32 %v414_v32, 0.0 }
  0xe2   :  { %v225_v34 = vpop.f32.mrf.mxu0 }
  0xe3   :  { %v248_v35 = vmax.f32 %v225_v34, 0.0  ;;  %416 = vmatpush3.msra.mxu1 %v249_v33 }
  0xe4   :  { %417 = vmatprep.subr.mxu1 %v475_v17 }
  0xe5   :  { %418 = vmatpush3.msra.mxu1 %v248_v35 }
  0xe6   :  { %419 = vmatprep.subr.mxu1 %v475_v17 }
  0xe7   :  { %420 = vmatpush3.msra.mxu1 %v247_v36 }
  0xe8   :  { %421 = vmatprep.subr.mxu1 %v475_v17 }
  0xe9   :  { %422 = vmatpush3.msra.mxu1 %v246_v37 }
  0xea   :  { %423 = vmatprep.subr.mxu1 %v475_v17 }
  0xeb   :  { %424 = vmatpush3.msra.mxu1 %v245_v38 }
  0xec   :  { %425 = vmatprep.subr.mxu1 %v475_v17 }
  0xed   :  { %426 = vmatpush3.msra.mxu1 %v244_v39 }
  0xee   :  { %427 = vmatprep.subr.mxu1 %v475_v17 }
  0xef   :  { %428 = vmatpush3.msra.mxu1 %v243_v40 }
  0xf0   :  { %429 = vmatprep.subr.mxu1 %v475_v17 }
  0xf1   :  { %430 = vmatpush3.msra.mxu1 %v242_v41 }
  0xf2   :  { %431 = vmatprep.subr.mxu1 %v475_v17 }
  0xf3   :  { %432 = vmatpush3.msra.mxu1 %v241_v42 }
  0xf4   :  { %433 = vmatprep.subr.mxu1 %v475_v17 }
  0xf5   :  { %434 = vmatpush3.msra.mxu1 %v240_v43 }
  0xf6   :  { %435 = vmatprep.subr.mxu1 %v475_v17 }
  0xf7   :  { %436 = vmatpush3.msra.mxu1 %v239_v44 }
  0xf8   :  { %437 = vmatprep.subr.mxu1 %v475_v17 }
  0xf9   :  { %438 = vmatpush3.msra.mxu1 %v238_v45 }
  0xfa   :  { %439 = vmatprep.subr.mxu1 %v475_v17 }
  0xfb   :  { %440 = vmatpush3.msra.mxu1 %v237_v46 }
  0xfc   :  { %441 = vmatprep.subr.mxu1 %v475_v17 }
  0xfd   :  { %442 = vmatpush3.msra.mxu1 %v236_v47 }
  0xfe   :  { %443 = vmatprep.subr.mxu1 %v475_v17 }
  0xff   :  { %444 = vmatpush3.msra.mxu1 %v235_v48 }
 0x100   :  { %445 = vmatprep.subr.mxu1 %v475_v17 }
 0x101   :  { %446 = vmatpush3.msra.mxu1 %v234_v49 }
 0x102   :  { %448 = vmatmul.mubr.f32.vlgmr.msra.gmra.mxu1 %v250_v50 }
 0x1c2   :  { %v319_v52 = vpop.f32.mrf.mxu1 }
 0x1c3   :  { %v320_v53 = vadd.f32 %v319_v52, %v252_v51 }
 0x1c4   :  { %v449_v54 = vpop.f32.mrf.mxu1 }
 0x1c5   :  { %323 = vst [vmem:[#allocation3] sm:$0x1] %v320_v53 }
 0x1c6   :  { %464 = shalt.err (!%p461_p4)
}
 0x1c7   :  { %333 = dma.vmem_to_hbm [thread:$0]  %s331_s25, 16, %s600_s4, [#allocation4]  }
 0x1c8   :  { %473 = dma.done.wait [#allocation4], 16  }
 0x1c9   :  { %474 = vsyncadd [#allocation4], 4294967280 }
 0x1ca   :  { %337 = vsyncpa [#allocation4], 1 }

</bundles_post_ra>
